<compile_context>
chip_gen: v6e
topology: v6e:2x2x1
jax: 0.10.0
libtpu: 0.0.40
codegen_flags: <defaults>
</compile_context>

<pallas_src>
import functools

import jax
import jax.numpy as jnp
from jax.experimental import pallas as pl
from jax.experimental.pallas import tpu as pltpu


_MAX_LANE_TILES = 256          # bounds the static per-chunk unroll (<= 32768 lanes)


def _fc_sigmoid_store(avg, mx, w1t_ref, w2t_ref, o_ref):
    """Shared finalize: fc(avg) + fc(mx) -> sigmoid -> store (1, C) lane-dense."""
    pooled = jnp.concatenate([avg, mx], axis=1)                  # (C, 2)
    w1t = w1t_ref[...].astype(jnp.float32)                       # (C, hidden)
    w2t = w2t_ref[...].astype(jnp.float32)                       # (hidden, C)
    h = jax.lax.dot_general(pooled, w1t,
                            dimension_numbers=(((0,), (0,)), ((), ())),
                            preferred_element_type=jnp.float32)  # (2, hidden)
    h = jnp.maximum(h, 0.0)                                      # ReLU
    y = jnp.dot(h, w2t, preferred_element_type=jnp.float32)      # (2, C)
    out = jax.nn.sigmoid(y[0:1, :] + y[1:2, :])                  # (1, C)
    o_ref[0] = out.astype(o_ref.dtype)


def _channel_attention_kernel(x_ref, w1t_ref, w2t_ref, o_ref,
                              sum_acc, max_acc,
                              *, s_total, s_tile, num_s):
    # x_ref block: (1, C, s_tile); w1t: (C, hidden); w2t: (hidden, C)
    # o_ref block: (1, 1, C); sum_acc / max_acc scratch: (C, 128) f32
    C = x_ref.shape[1]
    lane_partial = (s_tile % 128 == 0)

    if not lane_partial:
        # Single ragged chunk (S < cap and S % 128 != 0): reduce directly in one
        # pass, no cross-chunk accumulators or masking needed.
        n_full = s_total // 128
        rem = s_total - n_full * 128
        ps = pm = None
        for t in range(n_full):
            blk = x_ref[0, :, t * 128:(t + 1) * 128].astype(jnp.float32)
            ps = blk if ps is None else ps + blk
            pm = blk if pm is None else jnp.maximum(pm, blk)
        sum_part = max_part = None
        if ps is not None:
            sum_part = jnp.sum(ps, axis=-1, keepdims=True)        # (C, 1)
            max_part = jnp.max(pm, axis=-1, keepdims=True)        # (C, 1)
        if rem:
            tail = x_ref[0, :, n_full * 128:s_total].astype(jnp.float32)  # (C, rem)
            t_sum = jnp.sum(tail, axis=-1, keepdims=True)
            t_max = jnp.max(tail, axis=-1, keepdims=True)
            sum_part = t_sum if sum_part is None else sum_part + t_sum
            max_part = t_max if max_part is None else jnp.maximum(max_part, t_max)
        avg = sum_part * (1.0 / s_total)
        _fc_sigmoid_store(avg, max_part, w1t_ref, w2t_ref, o_ref)
        return

    # ---- streamed multi/aligned-chunk path ----
    s = pl.program_id(1)
    last = num_s - 1
    lane_tiles = s_tile // 128
    tail_len = s_total - last * s_tile          # valid elements in the last chunk
    needs_mask = tail_len < s_tile

    @pl.when(s == 0)
    def _init():
        sum_acc[...] = jnp.zeros_like(sum_acc)
        max_acc[...] = jnp.full(max_acc.shape, -jnp.inf, dtype=jnp.float32)

    def _accum_full():
        # Steady state: pure vld + VPU add/max over 128-lane tiles, no XLU.
        ps = pm = None
        for t in range(lane_tiles):
            blk = x_ref[0, :, t * 128:(t + 1) * 128].astype(jnp.float32)
            ps = blk if ps is None else ps + blk
            pm = blk if pm is None else jnp.maximum(pm, blk)
        sum_acc[...] += ps
        max_acc[...] = jnp.maximum(max_acc[...], pm)

    def _accum_masked():
        # Only ever executed on the last chunk; at most one lane tile is
        # partially valid, fully-invalid tiles are skipped at trace time.
        ps = pm = None
        for t in range(lane_tiles):
            lo = t * 128
            if lo >= tail_len:
                break
            blk = x_ref[0, :, lo:lo + 128].astype(jnp.float32)
            if lo + 128 > tail_len:
                lane = jax.lax.broadcasted_iota(jnp.int32, (C, 128), 1)
                valid = lane < (tail_len - lo)
                bs = jnp.where(valid, blk, 0.0)
                bm = jnp.where(valid, blk, -jnp.inf)
            else:
                bs = bm = blk
            ps = bs if ps is None else ps + bs
            pm = bm if pm is None else jnp.maximum(pm, bm)
        sum_acc[...] += ps
        max_acc[...] = jnp.maximum(max_acc[...], pm)

    if needs_mask:
        @pl.when(s < last)
        def _steady():
            _accum_full()

        @pl.when(s == last)
        def _tail():
            _accum_masked()
    else:
        _accum_full()

    @pl.when(s == last)
    def _finalize():
        # One cross-lane reduce per batch element (XLU), then the tiny FC.
        avg = jnp.sum(sum_acc[...], axis=-1, keepdims=True) * (1.0 / s_total)
        mx = jnp.max(max_acc[...], axis=-1, keepdims=True)
        _fc_sigmoid_store(avg, mx, w1t_ref, w2t_ref, o_ref)


def _default_spatial_tile_bytes():
    """Generation-aware block-byte target (smaller on 64 MiB-VMEM chips)."""
    vmem = None
    try:
        info = pltpu.get_tpu_info()
        vmem = getattr(info, "vmem_capacity_bytes", None)
    except Exception:
        vmem = None
    if vmem is not None and vmem <= (64 << 20):
        return 8 << 20      # v7x-class: keep double-buffered blocks well under 64 MiB
    return 12 << 20         # v5e/v6e: 128 MiB VMEM, amortize per-step overhead


def _choose_spatial_tile(C, S, itemsize, target_bytes):
    """Spatial tile (lanes): multiple of 128 (or full S), prefers divisors of S."""
    lanes_from_bytes = max(target_bytes // max(C * itemsize, 1), 128)
    floor_lanes = max(2048 // itemsize, 128)          # >= ~2 KiB contiguous per channel
    cap = min(lanes_from_bytes, _MAX_LANE_TILES * 128)
    cap = max((cap // 128) * 128, floor_lanes)
    if S <= cap:
        return S                                      # single full-extent chunk
    # Prefer a multiple of 128 (>= floor) that divides S exactly -> mask-free loop.
    t = cap
    while t >= floor_lanes:
        if S % t == 0:
            return t
        t -= 128
    return cap                                        # masked tail on the last chunk


def _vmem_limit_bytes(C, s_tile, itemsize, hidden):
    block = C * s_tile * itemsize
    weights = 2 * (C * hidden * 4)
    scratch = 2 * (C * 128 * 4)
    out = 2 * C * itemsize
    limit = 2 * block + 2 * weights + scratch + out + (4 << 20)   # double-buffer + slack
    return int(min(max(limit, 16 << 20), 48 << 20))


def channel_attention(x_ncdhw, w1, w2, *, spatial_tile_bytes=None):
    """x: (N, C, D, H, W); w1: (C//8, C); w2: (C, C//8) -> (N, C, 1, 1, 1)."""
    N, C, D, H, W = x_ncdhw.shape
    S = D * H * W
    hidden = w1.shape[0]
    if spatial_tile_bytes is None:
        spatial_tile_bytes = _default_spatial_tile_bytes()

    x = x_ncdhw.reshape(N, C, S)
    w1t = jnp.transpose(w1)        # (C, hidden)
    w2t = jnp.transpose(w2)        # (hidden, C)

    itemsize = jnp.dtype(x.dtype).itemsize
    s_tile = _choose_spatial_tile(C, S, itemsize, spatial_tile_bytes)
    num_s = pl.cdiv(S, s_tile)

    kernel = functools.partial(_channel_attention_kernel,
                               s_total=S, s_tile=s_tile, num_s=num_s)

    out = pl.pallas_call(
        kernel,
        out_shape=jax.ShapeDtypeStruct((N, 1, C), x.dtype),
        grid_spec=pltpu.PrefetchScalarGridSpec(
            num_scalar_prefetch=0,
            grid=(N, num_s),                       # reduction axis (S) last
            in_specs=[
                pl.BlockSpec((1, C, s_tile), lambda n, s: (n, 0, s)),
                pl.BlockSpec((C, hidden), lambda n, s: (0, 0)),
                pl.BlockSpec((hidden, C), lambda n, s: (0, 0)),
            ],
            out_specs=pl.BlockSpec((1, 1, C), lambda n, s: (n, 0, 0)),
            scratch_shapes=[
                pltpu.VMEM((C, 128), jnp.float32),   # lane-dense running sum
                pltpu.VMEM((C, 128), jnp.float32),   # lane-dense running max
            ],
        ),
        compiler_params=pltpu.CompilerParams(
            dimension_semantics=("parallel", "arbitrary"),
            vmem_limit_bytes=_vmem_limit_bytes(C, s_tile, itemsize, hidden),
        ),
    )(x, w1t, w2t)

    return out.reshape(N, C, 1, 1, 1)


def channel_attention_ref(x, w1, w2):
    """Pure-JAX reference matching the PyTorch forward."""
    avg = jnp.mean(x, axis=(2, 3, 4))              # (N, C)
    mx = jnp.max(x, axis=(2, 3, 4))                # (N, C)

    def fc(v):                                     # v: (N, C)
        h = jnp.maximum(v @ w1.T, 0.0)             # (N, C//8)
        return h @ w2.T                            # (N, C)

    out = jax.nn.sigmoid(fc(avg) + fc(mx))
    return out[:, :, None, None, None]


if __name__ == "__main__":
    key = jax.random.PRNGKey(0)
    k_x1, k_x2, k_x3, k_w1, k_w2 = jax.random.split(key, 5)

    N, C = 2, 16
    hidden = C // 8                                # in_planes // 8 = 2
    w1 = 0.1 * jax.random.normal(k_w1, (hidden, C), dtype=jnp.float32)
    w2 = 0.1 * jax.random.normal(k_w2, (C, hidden), dtype=jnp.float32)

    # Case A: S = 4*6*8 = 192 (ragged, < floor) -> single-chunk direct path.
    xa = jax.random.normal(k_x1, (N, C, 4, 6, 8), dtype=jnp.float32)
    out_a = jax.block_until_ready(channel_attention(xa, w1, w2))
    assert out_a.shape == (N, C, 1, 1, 1)
    assert jnp.allclose(out_a, channel_attention_ref(xa, w1, w2), atol=1e-5, rtol=1e-5)

    # Case B: S = 10*10*12 = 1200, forced 512-lane tile -> 3 chunks, masked
    # last chunk (one full tile + one partially masked tile + skipped tiles).
    xb = jax.random.normal(k_x2, (N, C, 10, 10, 12), dtype=jnp.float32)
    out_b = jax.block_until_ready(
        channel_attention(xb, w1, w2, spatial_tile_bytes=C * 4 * 512))
    assert jnp.allclose(out_b, channel_attention_ref(xb, w1, w2), atol=1e-5, rtol=1e-5)

    # Case B': same input, default generation-aware tile -> single chunk.
    out_b2 = jax.block_until_ready(channel_attention(xb, w1, w2))
    assert jnp.allclose(out_b2, channel_attention_ref(xb, w1, w2), atol=1e-5, rtol=1e-5)

    # Case C: S = 8*8*16 = 1024 with a 512-lane tile dividing S exactly ->
    # mask-free multi-chunk steady state (accumulators + pl.when finalize).
    xc = jax.random.normal(k_x3, (N, C, 8, 8, 16), dtype=jnp.float32)
    out_c = jax.block_until_ready(
        channel_attention(xc, w1, w2, spatial_tile_bytes=C * 4 * 512))
    assert jnp.allclose(out_c, channel_attention_ref(xc, w1, w2), atol=1e-5, rtol=1e-5)

    print("KERNEL_OK")
</pallas_src>

<mosaic_0001>
module attributes {stable_mosaic.version = 11 : i64} {
  func.func @_channel_attention_kernel(%arg0: i32, %arg1: i32, %arg2: memref<1x16x192xf32, #tpu.memory_space<vmem>>, %arg3: memref<16x2xf32, #tpu.memory_space<vmem>>, %arg4: memref<2x16xf32, #tpu.memory_space<vmem>>, %arg5: memref<1x1x16xf32, #tpu.memory_space<vmem>>, %arg6: memref<16x128xf32, #tpu.memory_space<vmem>>, %arg7: memref<16x128xf32, #tpu.memory_space<vmem>>) attributes {dimension_semantics = [#tpu.dimension_semantics<parallel>, #tpu.dimension_semantics<arbitrary>], iteration_bounds = array<i64: 2, 1>, scalar_prefetch = 0 : i64, scratch_operands = 2 : i64, tpu.core_type = #tpu.core_type<tc>, window_params = [{transform_indices = @transform_0, window_bounds = array<i64: 1, 16, 192>}, {pipeline_mode = #tpu.pipeline_mode<synchronous>, transform_indices = @transform_1, window_bounds = array<i64: 16, 2>}, {pipeline_mode = #tpu.pipeline_mode<synchronous>, transform_indices = @transform_2, window_bounds = array<i64: 2, 16>}, {transform_indices = @transform_3, window_bounds = array<i64: 1, 1, 16>}]} {
    %c0 = arith.constant 0 : index
    %c0_0 = arith.constant 0 : index
    %c0_1 = arith.constant 0 : index
    %0 = vector.load %arg2[%c0, %c0_0, %c0_1] : memref<1x16x192xf32, #tpu.memory_space<vmem>>, vector<1x16x128xf32>
    %1 = vector.shape_cast %0 : vector<1x16x128xf32> to vector<16x128xf32>
    %cst = arith.constant dense<0.000000e+00> : vector<16xf32>
    %2 = vector.multi_reduction <add>, %1, %cst [1] : vector<16x128xf32> to vector<16xf32>
    %3 = vector.shape_cast %2 : vector<16xf32> to vector<16x1xf32>
    %cst_2 = arith.constant dense<0xFF800000> : vector<16xf32>
    %4 = vector.multi_reduction <maximumf>, %1, %cst_2 [1] : vector<16x128xf32> to vector<16xf32>
    %5 = vector.shape_cast %4 : vector<16xf32> to vector<16x1xf32>
    %c0_3 = arith.constant 0 : index
    %c0_4 = arith.constant 0 : index
    %c128 = arith.constant 128 : index
    %6 = vector.load %arg2[%c0_3, %c0_4, %c128] : memref<1x16x192xf32, #tpu.memory_space<vmem>>, vector<1x16x64xf32>
    %7 = vector.shape_cast %6 : vector<1x16x64xf32> to vector<16x64xf32>
    %cst_5 = arith.constant dense<0.000000e+00> : vector<16xf32>
    %8 = vector.multi_reduction <add>, %7, %cst_5 [1] : vector<16x64xf32> to vector<16xf32>
    %9 = vector.shape_cast %8 : vector<16xf32> to vector<16x1xf32>
    %cst_6 = arith.constant dense<0xFF800000> : vector<16xf32>
    %10 = vector.multi_reduction <maximumf>, %7, %cst_6 [1] : vector<16x64xf32> to vector<16xf32>
    %11 = vector.shape_cast %10 : vector<16xf32> to vector<16x1xf32>
    %12 = arith.addf %3, %9 : vector<16x1xf32>
    %13 = arith.maximumf %5, %11 : vector<16x1xf32>
    %cst_7 = arith.constant 0.00520833349 : f32
    %14 = vector.broadcast %cst_7 : f32 to vector<16x1xf32>
    %15 = arith.mulf %12, %14 : vector<16x1xf32>
    %16 = tpu.concatenate %15, %13 in 1 : vector<16x1xf32>, vector<16x1xf32> -> vector<16x2xf32>
    %c0_8 = arith.constant 0 : index
    %c0_9 = arith.constant 0 : index
    %17 = vector.load %arg3[%c0_8, %c0_9] : memref<16x2xf32, #tpu.memory_space<vmem>>, vector<16x2xf32>
    %c0_10 = arith.constant 0 : index
    %c0_11 = arith.constant 0 : index
    %18 = vector.load %arg4[%c0_10, %c0_11] : memref<2x16xf32, #tpu.memory_space<vmem>>, vector<2x16xf32>
    %cst_12 = arith.constant dense<0.000000e+00> : vector<2x2xf32>
    %19 = tpu.matmul %16, %17, %cst_12 {dimension_numbers = #tpu.dot_dimension_numbers<[0], [0], [1], [1], [0, 1, 1, 1], [], []>} : vector<16x2xf32>, vector<16x2xf32>, vector<2x2xf32> -> vector<2x2xf32>
    %cst_13 = arith.constant 0.000000e+00 : f32
    %20 = vector.broadcast %cst_13 : f32 to vector<2x2xf32>
    %21 = arith.maximumf %19, %20 : vector<2x2xf32>
    %cst_14 = arith.constant dense<0.000000e+00> : vector<2x16xf32>
    %22 = tpu.matmul %21, %18, %cst_14 {dimension_numbers = #tpu.dot_dimension_numbers<[1], [0], [0], [1], [0, 0, 1, 1], [], []>} : vector<2x2xf32>, vector<2x16xf32>, vector<2x16xf32> -> vector<2x16xf32>
    %23 = vector.extract_strided_slice %22 {offsets = [0, 0], sizes = [1, 16], strides = [1, 1]} : vector<2x16xf32> to vector<1x16xf32>
    %24 = vector.extract_strided_slice %22 {offsets = [1, 0], sizes = [1, 16], strides = [1, 1]} : vector<2x16xf32> to vector<1x16xf32>
    %25 = arith.addf %23, %24 : vector<1x16xf32>
    %26 = arith.negf %25 : vector<1x16xf32>
    %27 = math.exp %26 : vector<1x16xf32>
    %cst_15 = arith.constant 1.000000e+00 : f32
    %28 = vector.broadcast %cst_15 : f32 to vector<1x16xf32>
    %29 = arith.addf %28, %27 : vector<1x16xf32>
    %30 = arith.divf %28, %29 : vector<1x16xf32>
    %c0_16 = arith.constant 0 : index
    %c0_17 = arith.constant 0 : index
    %c0_18 = arith.constant 0 : index
    %31 = vector.load %arg5[%c0_16, %c0_17, %c0_18] : memref<1x1x16xf32, #tpu.memory_space<vmem>>, vector<1x1x16xf32>
    %32 = vector.shape_cast %31 : vector<1x1x16xf32> to vector<1x16xf32>
    %33 = vector.shape_cast %30 : vector<1x16xf32> to vector<1x1x16xf32>
    tpu.vector_store %arg5[%c0_16, %c0_17, %c0_18], %33 {strides = array<i32>} : memref<1x1x16xf32, #tpu.memory_space<vmem>>, vector<1x1x16xf32>,
    return
  }
  func.func @transform_0(%arg0: i32, %arg1: i32) -> (i32, i32, i32) {
    %c0_i32 = arith.constant 0 : i32
    %c0_i32_0 = arith.constant 0 : i32
    return %arg0, %c0_i32, %arg1 : i32, i32, i32
  }
  func.func @transform_1(%arg0: i32, %arg1: i32) -> (i32, i32) {
    %c0_i32 = arith.constant 0 : i32
    %c0_i32_0 = arith.constant 0 : i32
    %c0_i32_1 = arith.constant 0 : i32
    return %c0_i32, %c0_i32_0 : i32, i32
  }
  func.func @transform_2(%arg0: i32, %arg1: i32) -> (i32, i32) {
    %c0_i32 = arith.constant 0 : i32
    %c0_i32_0 = arith.constant 0 : i32
    %c0_i32_1 = arith.constant 0 : i32
    return %c0_i32, %c0_i32_0 : i32, i32
  }
  func.func @transform_3(%arg0: i32, %arg1: i32) -> (i32, i32, i32) {
    %c0_i32 = arith.constant 0 : i32
    %c0_i32_0 = arith.constant 0 : i32
    %c0_i32_1 = arith.constant 0 : i32
    return %arg0, %c0_i32, %c0_i32_0 : i32, i32, i32
  }
}

</mosaic_0001>

<bundles_post_ra>
// kernel: tpu_custom_call.1
= control target key start
LH: loop header
LB: loop body
LE: loop exit
PB: predicated region body
PF: predicated region fallthrough
CT: control target
= control target key end

     0   :  { %8 = vsyncpa [#allocation5], 0  ;;  %s914_s0 = inlined_call_operand.hbm [shape: f32[2,16,192], index: 0, kind: input, shape index: {}]   ;;  %s915_s1 = inlined_call_operand.vmem [shape: f32[16,2], index: 1, kind: input, shape index: {}]   ;;  %s916_s2 = inlined_call_operand.vmem [shape: f32[2,16], index: 2, kind: input, shape index: {}]   ;;  %s917_s3 = inlined_call_operand.hbm [shape: f32[2,1,16], index: 3, kind: output, shape index: {}]  }
   0x1   :  { %10 = vsyncpa [#allocation5 + $0x1], 0 }
   0x2   :  { %11 = vsyncpa [#allocation6], 0 }
   0x3   :  { %13 = vsyncpa [#allocation6 + $0x1], 0  ;;  %s766_s12 = smov 0   ;;  %s768_s13 = smov 0  }
   0x4   :  { %s770_s14 = smov 0   ;;  %s772_s15 = smov 0  }
   0x5   :  { %s774_s16 = smov 0   ;;  %s776_s17 = smov 0  }
   0x6 LB: > { %s526_s18 = sadd.s32 4294967295, %s738_s17   ;;  %s527_s19 = sadd.s32 4294967294, %s738_s17   ;;  %s738_s17 = sphi %s776_s17, %s19_s17   ;;  %s734_s16 = sphi %s774_s16, %s928_s16   ;;  %s730_s15 = sphi %s772_s15, %s927_s15   ;;  %s726_s14 = sphi %s770_s14, %s926_s14   ;;  %s722_s13 = sphi %s768_s13, %s925_s13   ;;  %s718_s12 = sphi %s766_s12, %s924_s12  }
   0x7   : > { %s31_s20 = sadd.s32 1, %s734_s16  ;;  %s40_s21 = sadd.s32 1, %s726_s14 }
   0x8   : > { %p33_p0 = scmp.ge.s32.totalorder %s31_s20, 2  ;;  %p47_p1 = scmp.ne.s32.totalorder %s726_s14, %s722_s13 }
   0x9   : > { %p48_p2 = scmp.eq.s32.totalorder %s738_s17, 0  ;;  %p53_p3 = scmp.ne.s32.totalorder %s722_s13, %s718_s12 }
   0xa   : > { %s930_s20 = smov (%p33_p0, %s31_s20), 0  ;;  %p54_p5 = scmp.eq.s32.totalorder %s526_s18, 0 }
   0xb   : > { %p807_p4 = por %p48_p2, %p47_p1  ;;  %s35_s23 = ssub.s32 %s734_s16, %s930_s20 }
   0xc   : > { %p119_p6 = scmp.eq.s32.totalorder %s526_s18, 1  ;;  %p38_p7 = scmp.eq.s32.totalorder %s35_s23, 0 }
   0xd   : > { %p813_p8 = por %p54_p5, %p53_p3  ;;  %p125_p10 = scmp.eq.s32.totalorder %s527_s19, 1 }
   0xe   : > { %p817_p9 = por %p119_p6, %p47_p1  ;;  %p572_p13 = scmp.lt.s32.totalorder %s738_s17, 2 }
   0xf   : > { %s822_s26 = scalar_select %p38_p7, %s726_s14, %s40_s21  }
  0x10   : > { %p824_p11 = por %p125_p10, %p53_p3  ;;  %s151_s28 = sand.u32 1, %s726_s14  }
  0x11   : > { %s530_s29 = sshll.u32 %s151_s28, 5  ;;  %s542_s30 = sshll.u32 %s734_s16, 9 }
  0x12   : > { %s163_s6 = scalar_lea.hbm %s914_s0, %s542_s30  ;;  %s155_s7 = scalar_lea.vmem [#allocation4], %s530_s29 }
  0x13   : > { %s164_s8 = sshll.u32 %s155_s7, 4  ;;  %p837_p0 = pnand %p572_p13, %p807_p4  ;;  %s165_s8 = int_to_ptr.vmem [resolvable:$true] %s164_s8 }
  0x14   : > { %p533_p1 = scmp.ge.s32.totalorder %s738_s17, 1  ;;  %s152_s10 = scalar_lea.sflag [#allocation5], %s151_s28 }
  0x15   : > { %p632_p2 = pneg %p837_p0  ;;  %s643_s11 = scalar_lea.vmem %s165_s8, 512 }
  0x16   : > { %p644_p3 = scmp.ne.s32.totalorder %s165_s8, %s643_s11  ;;  %s740_s18 = smov [#allocation4]  }
  0x17   : > { %s648_s19 = sshll.u32 %s740_s18, 4  ;;  %s649_s19 = int_to_ptr.vmem [resolvable:$false] %s648_s19 }
  0x18   : > { %p646_p5 = pnand %p644_p3, %p632_p2  ;;  %s650_s21 = scalar_lea.vmem %s649_s19, 1024 }
  0x19   : > { %p651_p7 = scmp.lt.s32.totalorder %s165_s8, %s649_s19  ;;  %p652_p10 = scmp.lt.s32.totalorder %s650_s21, %s643_s11 }
  0x1a   : > { %p647_p6 = pneg %p646_p5 }
  0x1b   : > { %p653_p12 = por %p652_p10, %p651_p7 }
  0x1d   : > { %p654_p4 = pnand %p653_p12, %p647_p6 }
  0x1f   : > { %657 = shalt.err (!%p654_p4)
}
  0x20   : > { %s741_s22 = smov 256   ;;  %s742_s23 = smov 16  }
  0x21   : > { %567 = dma.hbm_to_vmem [thread:$0]  (!%p837_p0), %s163_s6, 512, %s165_s8, %s152_s10, %s741_s22, %s741_s22, %s742_s23  }
  0x22   : > { %p172_p13 = scmp.lt.s32.totalorder %s738_s17, 3 }
  0x24   : > { %p173_p2 = pnand %p533_p1, %p172_p13 }
  0x25   : > { %s850_s28 = sand.u32 (!%p173_p2), 1, %s722_s13  }
  0x26   : > { %176 = sbr.rel (%p173_p2) target bundleno = 756 (0x2f4), region = 32  ;;  %s534_s29 = sshll.u32 (!%p173_p2), %s850_s28, 5 }
  0x27   : > { %s179_s30 = scalar_lea.sflag (!%p173_p2), [#allocation5], %s850_s28  ;;  %s182_s4 = scalar_lea.vmem (!%p173_p2), [#allocation4], %s534_s29 }
  0x2b   : > { %709 = dma.done.wait (%p813_p8), %s179_s30, 512  }
  0x2c   : > { %711 = vsyncadd (%p813_p8), %s179_s30, 4294966784  ;;  %vm217_vm0 = vcmask 523264   ;;  %v206_v0 = vld [vmem:[%s182_s4 + $0x10] sm:$0xff]  ;;  %v205_v1 = vld [vmem:[%s182_s4] sm:$0xff]  ;;  %v743_v9 = vmov 0.0   ;;  %vm744_vm1 = vmmov 0  }
  0x2d   : > { %v215_v2 = vld [vmem:[%s182_s4 + $0x8] sm:$0xff]  ;;  %209 = vadd.xlane.f32.xlu1 %v206_v0  ;;  %207 = vadd.xlane.f32.xlu0 %v205_v1  ;;  %v216_v4 = vld [vmem:[%s182_s4 + $0x18] sm:$0xff]  ;;  %v239_v10 = vld [vmem:[%s915_s1] sm:$0xff]  ;;  %vm236_vm2 = vcmask 7168   ;;  %vm274_vm3 = vcmask 130048   ;;  %vm353_vm4 = vcmask 1041408  }
  0x2e   : > { %v218_v3 = vsel %vm217_vm0, %v215_v2, 0.0  ;;  %v224_v5 = vsel %vm217_vm0, %v215_v2, -inf  ;;  %v221_v6 = vsel %vm217_vm0, %v216_v4, 0.0  ;;  %v227_v7 = vsel %vm217_vm0, %v216_v4, -inf  ;;  %v240_v8 = vld [vmem:[%s915_s1 + $0x8] sm:$0xff]  ;;  %548 = vmatprep.subr.mxu0 %v743_v9  ;;  %552 = vmatprep.mubr.msk.f32.mxu0 %vm744_vm1, %v743_v9  ;;  %s539_s10 = sshll.u32 %s730_s15, 4 }
  0x2f   : > { %549 = vmatpush3.msra.mxu0 %v240_v8  ;;  %555 = vmatprep.subr.mxu1 %v743_v9  ;;  %v241_v28 = vld [vmem:[%s916_s2] sm:$0x3]  ;;  %vm349_vm5 = vcmask 15360   ;;  %s203_s11 = scalar_lea.vmem [#allocation7], %s850_s28  ;;  %vm437_vm6 = vcmask 122880   ;;  %s872_s22 = scalar_lea.hbm %s917_s3, %s539_s10 }
  0x30   : > { %550 = vmatprep.subr.mxu0 %v743_v9  ;;  %557 = vmatprep.mubr.msk.f32.mxu1 %vm744_vm1, %v743_v9  ;;  %s452_s18 = sshll.u32 %s203_s11, 4  ;;  %s440_s23 = scalar_lea.sflag [#allocation6], %s850_s28  ;;  %s453_s18 = int_to_ptr.vmem [resolvable:$true] %s452_s18 }
  0x31   : > { %211 = vmax.xlane.f32.xlu1 %v205_v1  ;;  %219 = vadd.xlane.f32.xlu0 %v218_v3  ;;  %s658_s29 = scalar_lea.vmem %s453_s18, 16  ;;  %s745_s30 = smov [#allocation7]  }
  0x32   : > { %551 = vmatpush3.msra.mxu0 %v239_v10  ;;  %556 = vmatpush3.msk.msra.mxu1 %vm353_vm4, %v241_v28  ;;  %p659_p8 = scmp.ne.s32.totalorder %s453_s18, %s658_s29  ;;  %s662_s4 = sshll.u32 %s745_s30, 4  ;;  %s663_s4 = int_to_ptr.vmem [resolvable:$false] %s662_s4 }
  0x33   : > { %s664_s15 = scalar_lea.vmem %s663_s4, 32  ;;  %p665_p1 = scmp.lt.s32.totalorder %s453_s18, %s663_s4 }
  0x34   : > { %p660_p12 = pnand %p659_p8, %p817_p9  ;;  %p666_p3 = scmp.lt.s32.totalorder %s664_s15, %s658_s29 }
  0x35   : > { %225 = vmax.xlane.f32.xlu1 %v224_v5  ;;  %222 = vadd.xlane.f32.xlu0 %v221_v6 }
  0x36   : > { %p661_p0 = pneg %p660_p12  ;;  %p667_p5 = por %p666_p3, %p665_p1 }
  0x38   : > { %p668_p6 = pnand %p667_p5, %p661_p0 }
  0x39   : > { %228 = vmax.xlane.f32.xlu1 %v227_v7  ;;  %213 = vmax.xlane.f32.xlu0 %v206_v0 }
  0xb6   : > { %v210_v11 = vpop.xlane.xlu1 %209  ;;  %v208_v12 = vpop.xlane.xlu0 %207 }
  0xba   : > { %v212_v13 = vpop.xlane.xlu1 %211  ;;  %v220_v14 = vpop.xlane.xlu0 %219 }
  0xbb   : > { %v230_v15 = vadd.f32 %v220_v14, %v208_v12 }
  0xbd   : > { %v234_v18 = vmul.f32 0.0052083335, %v230_v15 }
  0xbe   : > { %v226_v16 = vpop.xlane.xlu1 %225  ;;  %v223_v17 = vpop.xlane.xlu0 %222 }
  0xbf   : > { %v232_v19 = vmax.f32 %v212_v13, %v226_v16  ;;  %v231_v20 = vadd.f32 %v223_v17, %v210_v11 }
  0xc1   : > { %v237_v21 = vsel %vm236_vm2, %v234_v18, %v232_v19  ;;  %v235_v24 = vmul.f32 0.0052083335, %v231_v20 }
  0xc2   : > { %v229_v22 = vpop.xlane.xlu1 %228  ;;  %242 = vxpose.xlu0.b32.start [1/2] (short) (narrow) %v237_v21, 8  ;;  %v214_v23 = vpop.xlane.xlu0 %213 }
  0xc3   : > { %v233_v25 = vmax.f32 %v214_v23, %v229_v22 }
  0xc5   : > { %v238_v26 = vsel %vm236_vm2, %v235_v24, %v233_v25 }
  0xc6   : > { %243 = vxpose.xlu0.b32.end [2/2] (short) (narrow) %v238_v26, 8 }
 0x13e   : > { %v258_v27 = vpop.trf.xlu0 }
 0x13f   : > { %553 = vmatmul.mubr.msk.f32.vlgmr.msra.gmra.mxu0 %vm274_vm3, %v258_v27 }
 0x1ff   : > { %v344_v29 = vpop.f32.mrf.mxu0 }
 0x200   : > { %v348_v30 = vmax.f32 %v344_v29, 0.0 }
 0x201   : > { %v554_v31 = vpop.f32.mrf.mxu0 }
 0x202   : > { %558 = vmatmul.mubr.msk.f32.vlgmr.msra.gmra.mxu1 %vm349_vm5, %v348_v30 }
 0x2c2   : > { %v423_v32 = vpop.f32.mrf.mxu1 }
 0x2c3   : > { %v428_v33 = vrot.slane %v423_v32, 1 }
 0x2c4   : > { %v559_v34 = vpop.f32.mrf.mxu1 }
 0x2c5   : > { %v430_v35 = vadd.f32 %v428_v33, %v423_v32 }
 0x2c7   : > { %v538_v36 = vmul.f32 -1.442695, %v430_v35 }
 0x2c9   : > { %626 = vpow2.f32 %v538_v36 }
 0x2d6   : > { %v627_v37 = vpop.eup %626 }
 0x2d7   : > { %v434_v38 = vadd.f32 1.0, %v627_v37 }
 0x2d9   : > { %628 = vrcp.f32 %v434_v38 }
 0x2e6   : > { %v629_v39 = vpop.eup %628 }
 0x2e7   : > { %438 = vst.msk [vmem:[%s203_s11] sm:$0x1] %vm437_vm6, %v629_v39 }
 0x2e8   : > { %671 = shalt.err (!%p668_p6)
}
 0x2e9   : > { %s672_s5 = scalar_lea.hbm %s872_s22, 16  ;;  %s676_s6 = scalar_lea.hbm %s917_s3, 32 }
 0x2ea   : > { %p673_p7 = scmp.ne.s32.totalorder %s872_s22, %s672_s5  ;;  %p677_p13 = scmp.lt.s32.totalorder %s872_s22, %s917_s3 }
 0x2eb   : > { %p678_p2 = scmp.lt.s32.totalorder %s676_s6, %s672_s5 }
 0x2ec   : > { %p674_p10 = pnand %p673_p7, %p817_p9 }
 0x2ed   : > { %p679_p8 = por %p678_p2, %p677_p13 }
 0x2ee   : > { %p675_p4 = pneg %p674_p10 }
 0x2f0   : > { %p680_p12 = pnand %p679_p8, %p675_p4 }
 0x2f2   : > { %683 = shalt.err (!%p680_p12)
}
 0x2f3   : > { %562 = dma.vmem_to_hbm [thread:$0]  (%p817_p9), %s453_s18, 16, %s872_s22, %s440_s23  }
 0x2f4 PF: > { %s464_s9 = sand.u32 1, %s718_s12   ;;  %p923_p0 = scmp.ge.s32.totalorder %s738_s17, 2 }
 0x2f5   : > { %s465_s10 = scalar_lea.sflag [#allocation6], %s464_s9 }
 0x2f6   : > { %p569_p1 = pnand %p923_p0, %p824_p11 }
 0x2f8   : > { %p570_p3 = pneg %p569_p1 }
 0x2fa   : > { %713 = dma.done.wait (%p570_p3), %s465_s10, 16  }
 0x2fb   : > { %715 = vsyncadd (%p570_p3), %s465_s10, 4294967280  ;;  %s19_s17 = sadd.s32 1, %s738_s17   ;;  %s924_s12 = smov %s722_s13 }
 0x2fc   : > { %p16_p5 = scmp.ge.s32.totalorder %s19_s17, 4   ;;  %s925_s13 = smov %s726_s14 }
 0x2fd   : > { %s926_s14 = smov %s822_s26  ;;  %s927_s15 = smov %s734_s16 }
 0x2fe   : > { %s928_s16 = smov %s930_s20  ;;  %18 = sbr.rel (!%p16_p5) target bundleno = 6 (0x6), region = 77 }
 0x303   :  { %469 = vsyncpa [#allocation5], 1 }
 0x304   :  { %471 = vsyncpa [#allocation5 + $0x1], 1 }
 0x305   :  { %472 = vsyncpa [#allocation6], 1 }
 0x306   :  { %474 = vsyncpa [#allocation6 + $0x1], 1 }

</bundles_post_ra>
